<compile_context>
chip_gen: v7x
topology: tpu7x:2x2x1
jax: 0.10.0
libtpu: 0.0.40
codegen_flags: <defaults>
</compile_context>

<pallas_src>
import jax
import jax.numpy as jnp
from jax.experimental import pallas as pl
from jax.experimental.pallas import tpu as pltpu


def _layer_norm(x, gamma, beta, eps=1e-5):
    # x: (M, C) f32; gamma/beta: (1, C).  PyTorch LayerNorm (biased variance).
    # Single-pass variance: var = E[x^2] - E[x]^2 (clamped >= 0 for robustness).
    mean = jnp.mean(x, axis=-1, keepdims=True)
    mean_sq = jnp.mean(x * x, axis=-1, keepdims=True)
    var = jnp.maximum(mean_sq - mean * mean, 0.0)
    return (x - mean) * jax.lax.rsqrt(var + eps) * gamma + beta


def encoder_row_kernel(x_ref, attn_ref, w1_ref, b1_ref, w2_ref, b2_ref,
                       g1_ref, be1_ref, g2_ref, be2_ref, o_ref):
    """Row-wise: residual + LN1 + FFN(relu) + residual + LN2 on a (TM, C) tile."""
    x = x_ref[0].astype(jnp.float32)                        # (TM, C)
    attn = attn_ref[0]                                      # (1, C) f32, row-broadcast

    x1 = _layer_norm(x + attn, g1_ref[...], be1_ref[...])   # dropout1 == identity

    h1 = jnp.dot(x1.astype(w1_ref.dtype), w1_ref[...],
                 preferred_element_type=jnp.float32) + b1_ref[...]
    h1 = jnp.maximum(h1, 0.0)
    ff = jnp.dot(h1.astype(w2_ref.dtype), w2_ref[...],
                 preferred_element_type=jnp.float32) + b2_ref[...]

    x2 = _layer_norm(x1 + ff, g2_ref[...], be2_ref[...])    # dropout2 == identity
    o_ref[0] = x2.astype(o_ref.dtype)


def _default_row_tile():
    # 512 rows on 128-MiB-VMEM parts (v5e/v6e), 256 on v7x (64 MiB physical VMEM).
    # Both are multiples of 128 (v5e MXU block) and 256 (v6e/v7x MXU block).
    try:
        vmem = getattr(pltpu.get_tpu_info(), "vmem_capacity_bytes", 64 << 20)
    except Exception:
        return 256
    return 512 if vmem >= (100 << 20) else 256


def _pick_row_tile(n, row_tile):
    tm = min(row_tile, n)
    if n % tm == 0:
        return tm
    # Prefer a tile that divides N (no masked edge stores); must stay a multiple of 8.
    for cand in range(tm - (tm % 8), max(tm // 2, 8) - 1, -8):
        if cand > 0 and n % cand == 0:
            return cand
    # Ragged edge tile: math is row-independent and output stores are masked, so
    # this is still correct, just slightly less efficient.
    return tm


def _vmem_limit_bytes(weight_arrays, tile_bytes, weight_buffers):
    need = weight_buffers * sum(int(a.size) * a.dtype.itemsize for a in weight_arrays)
    need += 6 * int(tile_bytes) + (4 << 20)
    # Floor at the v5e scoped default; cap at 48 MiB to leave headroom below v7x's
    # 64 MiB physical VMEM for Mosaic internal scratch / semaphores.
    return int(min(max(need, 16 << 20), 48 << 20))


def transformer_encoder_layer(x, params, num_heads, *, row_tile=None,
                              use_bf16_matmul=True):
    """Forward pass of TransformerEncoderLayer (eval mode, dropout == identity).

    `num_heads` is accepted for API parity; the reference (degenerate) attention
    output is independent of the head split, so it is unused here.
    """
    del num_heads
    B, N, C = x.shape
    H = params["w1"].shape[1]

    mm_dtype = jnp.bfloat16 if use_bf16_matmul else x.dtype
    w1 = params["w1"].astype(mm_dtype)
    w2 = params["w2"].astype(mm_dtype)

    # ---- Attention summary row (former Pass 1), now two small XLA ops ------------
    #   attn[b] = ((sum_n x[b]) @ Wv + N*bv) @ Wo + bo = (sum_n x[b]) @ Wvo + bias
    wv = params["wv"].astype(jnp.float32)
    wo = params["wo"].astype(jnp.float32)
    wvo = wv @ wo                                                     # (C, C) f32
    attn_bias = float(N) * params["bv"].astype(jnp.float32) @ wo + params["bo"]
    x_sum = jnp.sum(x.astype(jnp.float32), axis=1)                    # (B, C) f32
    attn = (x_sum @ wvo + attn_bias)[:, None, :]                      # (B, 1, C) f32

    # ---- Pallas pass: row-tiled residual + LN1 + FFN + LN2 ------------------------
    if row_tile is None:
        row_tile = _default_row_tile()
    tm = _pick_row_tile(N, row_tile)
    num_row_tiles = pl.cdiv(N, tm)

    weight_arrays = (w1, w2)
    small_arrays = (params["b1"], params["b2"],
                    params["gamma1"], params["beta1"],
                    params["gamma2"], params["beta2"])

    cost = pl.CostEstimate(
        flops=int(4 * B * N * C * H),                 # two matmuls, 2*M*K*N each
        transcendentals=int(2 * B * N),               # two rsqrt per row
        bytes_accessed=int(2 * B * N * C * x.dtype.itemsize
                           + sum(int(a.size) * a.dtype.itemsize
                                 for a in weight_arrays + small_arrays)
                           + int(attn.size) * 4),
    )

    def run(single_buffer_weights):
        def full_spec(shape):
            return pl.BlockSpec(shape, lambda *_: (0,) * len(shape))

        def weight_spec(shape):
            # Constant index map -> the weight tile is fetched exactly once; a single
            # buffer loses no DMA overlap and halves its VMEM footprint (v7x).
            if single_buffer_weights:
                return pl.BlockSpec(shape, lambda *_: (0,) * len(shape),
                                    pipeline_mode=pl.Buffered(buffer_count=1))
            return full_spec(shape)

        wbuf = 1 if single_buffer_weights else 2
        return pl.pallas_call(
            encoder_row_kernel,
            out_shape=jax.ShapeDtypeStruct((B, N, C), x.dtype),
            grid_spec=pltpu.PrefetchScalarGridSpec(
                num_scalar_prefetch=0,
                # Row-tile axis first so the (usually larger) axis carries the
                # v7x megacore split even when B is 1 or odd.
                grid=(num_row_tiles, B),
                in_specs=[
                    pl.BlockSpec((1, tm, C), lambda t, b: (b, t, 0)),   # x row tile
                    pl.BlockSpec((1, 1, C), lambda t, b: (b, 0, 0)),    # attn row
                    weight_spec((C, H)), full_spec((1, H)),             # w1, b1
                    weight_spec((H, C)), full_spec((1, C)),             # w2, b2
                    full_spec((1, C)), full_spec((1, C)),               # gamma1, beta1
                    full_spec((1, C)), full_spec((1, C)),               # gamma2, beta2
                ],
                out_specs=pl.BlockSpec((1, tm, C), lambda t, b: (b, t, 0)),
            ),
            compiler_params=pltpu.CompilerParams(
                dimension_semantics=("parallel", "parallel"),
                vmem_limit_bytes=_vmem_limit_bytes(
                    weight_arrays,
                    tile_bytes=tm * (C + H) * 4,
                    weight_buffers=wbuf),
            ),
            cost_estimate=cost,
        )(x, attn, w1, params["b1"], w2, params["b2"],
          params["gamma1"], params["beta1"], params["gamma2"], params["beta2"])

    try:
        return run(single_buffer_weights=True)
    except Exception:
        # This jax/Mosaic build rejects pl.Buffered(1); fall back to default
        # double-buffering (correctness is identical).
        return run(single_buffer_weights=False)


def init_params(key, embed_dim, hidden_dim):
    ks = jax.random.split(key, 12)
    s = 0.1
    p = {
        # Linear weights stored as (in, out) so the kernel does x @ W + b.
        # wq/bq/wk/bk are kept for interface parity with the PyTorch module,
        # but are mathematically dead in its forward pass (see header note).
        "wq": jax.random.normal(ks[0], (embed_dim, embed_dim), jnp.float32) * s,
        "bq": jax.random.normal(ks[1], (1, embed_dim), jnp.float32) * s,
        "wk": jax.random.normal(ks[2], (embed_dim, embed_dim), jnp.float32) * s,
        "bk": jax.random.normal(ks[3], (1, embed_dim), jnp.float32) * s,
        "wv": jax.random.normal(ks[4], (embed_dim, embed_dim), jnp.float32) * s,
        "bv": jax.random.normal(ks[5], (1, embed_dim), jnp.float32) * s,
        "wo": jax.random.normal(ks[6], (embed_dim, embed_dim), jnp.float32) * s,
        "bo": jax.random.normal(ks[7], (1, embed_dim), jnp.float32) * s,
        "w1": jax.random.normal(ks[8], (embed_dim, hidden_dim), jnp.float32) * s,
        "b1": jax.random.normal(ks[9], (1, hidden_dim), jnp.float32) * s,
        "w2": jax.random.normal(ks[10], (hidden_dim, embed_dim), jnp.float32) * s,
        "b2": jax.random.normal(ks[11], (1, embed_dim), jnp.float32) * s,
        "gamma1": jnp.ones((1, embed_dim), jnp.float32),
        "beta1": jnp.zeros((1, embed_dim), jnp.float32),
        "gamma2": jnp.ones((1, embed_dim), jnp.float32),
        "beta2": jnp.zeros((1, embed_dim), jnp.float32),
    }
    return p


def reference_layer(x, params, num_heads):
    """Pure-JAX f32 reference reproducing the PyTorch module verbatim
    (including the dead Q/K/softmax math and the degenerate einsum)."""
    B, N, C = x.shape
    hd = C // num_heads
    q = x @ params["wq"] + params["bq"]
    k = x @ params["wk"] + params["bk"]
    v = x @ params["wv"] + params["bv"]

    def split(a):
        return a.reshape(B, N, num_heads, hd).transpose(0, 2, 1, 3)

    Q, K, V = split(q), split(k), split(v)
    scores = jnp.einsum("bnqd,bnkd->bnqk", Q, K) / (hd ** 0.5)
    w = jax.nn.softmax(scores, axis=-1)
    attn = jnp.einsum("bnqk,bnvd->bnqd", w, V)       # degenerate reference einsum
    attn = attn.transpose(0, 2, 1, 3).reshape(B, N, C)
    attn = attn @ params["wo"] + params["bo"]

    def ln(y, g, b, eps=1e-5):
        m = jnp.mean(y, axis=-1, keepdims=True)
        va = jnp.mean((y - m) ** 2, axis=-1, keepdims=True)
        return (y - m) * jax.lax.rsqrt(va + eps) * g + b

    x1 = ln(x + attn, params["gamma1"], params["beta1"])
    h = jnp.maximum(x1 @ params["w1"] + params["b1"], 0.0)
    ff = h @ params["w2"] + params["b2"]
    return ln(x1 + ff, params["gamma2"], params["beta2"])


if __name__ == "__main__":
    B, N, C = 2, 8, 32          # batch, seq, embed_dim
    num_heads = 4
    hidden_dim = 64

    key = jax.random.PRNGKey(0)
    kx, kp = jax.random.split(key)
    x = jax.random.normal(kx, (B, N, C), jnp.float32)
    params = init_params(kp, C, hidden_dim)

    out = transformer_encoder_layer(x, params, num_heads)
    out = jax.block_until_ready(out)
    assert out.shape == (B, N, C)
    assert bool(jnp.all(jnp.isfinite(out)))

    # Correctness vs. the full f32 reference (tolerance covers bf16 MXU operands).
    ref = reference_layer(x, params, num_heads)
    max_err = float(jnp.max(jnp.abs(out - ref)))
    assert max_err < 1e-1, f"max abs error {max_err}"

    print("KERNEL_OK")
</pallas_src>

<mosaic_0001>
module attributes {stable_mosaic.version = 11 : i64} {
  func.func @encoder_row_kernel(%arg0: i32, %arg1: i32, %arg2: memref<1x8x32xf32, #tpu.memory_space<vmem>>, %arg3: memref<1x1x32xf32, #tpu.memory_space<vmem>>, %arg4: memref<32x64xbf16, #tpu.memory_space<vmem>>, %arg5: memref<1x64xf32, #tpu.memory_space<vmem>>, %arg6: memref<64x32xbf16, #tpu.memory_space<vmem>>, %arg7: memref<1x32xf32, #tpu.memory_space<vmem>>, %arg8: memref<1x32xf32, #tpu.memory_space<vmem>>, %arg9: memref<1x32xf32, #tpu.memory_space<vmem>>, %arg10: memref<1x32xf32, #tpu.memory_space<vmem>>, %arg11: memref<1x32xf32, #tpu.memory_space<vmem>>, %arg12: memref<1x8x32xf32, #tpu.memory_space<vmem>>) attributes {dimension_semantics = [#tpu.dimension_semantics<parallel>, #tpu.dimension_semantics<parallel>], iteration_bounds = array<i64: 1, 2>, scalar_prefetch = 0 : i64, scratch_operands = 0 : i64, tpu.core_type = #tpu.core_type<tc>, window_params = [{transform_indices = @transform_0, window_bounds = array<i64: 1, 8, 32>}, {transform_indices = @transform_1, window_bounds = array<i64: 1, 1, 32>}, {pipeline_mode = #tpu.pipeline_mode<synchronous>, transform_indices = @transform_2, window_bounds = array<i64: 32, 64>}, {pipeline_mode = #tpu.pipeline_mode<synchronous>, transform_indices = @transform_3, window_bounds = array<i64: 1, 64>}, {pipeline_mode = #tpu.pipeline_mode<synchronous>, transform_indices = @transform_4, window_bounds = array<i64: 64, 32>}, {pipeline_mode = #tpu.pipeline_mode<synchronous>, transform_indices = @transform_5, window_bounds = array<i64: 1, 32>}, {pipeline_mode = #tpu.pipeline_mode<synchronous>, transform_indices = @transform_6, window_bounds = array<i64: 1, 32>}, {pipeline_mode = #tpu.pipeline_mode<synchronous>, transform_indices = @transform_7, window_bounds = array<i64: 1, 32>}, {pipeline_mode = #tpu.pipeline_mode<synchronous>, transform_indices = @transform_8, window_bounds = array<i64: 1, 32>}, {pipeline_mode = #tpu.pipeline_mode<synchronous>, transform_indices = @transform_9, window_bounds = array<i64: 1, 32>}, {transform_indices = @transform_10, window_bounds = array<i64: 1, 8, 32>}]} {
    %c0 = arith.constant 0 : index
    %c0_0 = arith.constant 0 : index
    %c0_1 = arith.constant 0 : index
    %0 = vector.load %arg2[%c0, %c0_0, %c0_1] : memref<1x8x32xf32, #tpu.memory_space<vmem>>, vector<1x8x32xf32>
    %1 = vector.shape_cast %0 : vector<1x8x32xf32> to vector<8x32xf32>
    %c0_2 = arith.constant 0 : index
    %c0_3 = arith.constant 0 : index
    %c0_4 = arith.constant 0 : index
    %2 = vector.load %arg3[%c0_2, %c0_3, %c0_4] : memref<1x1x32xf32, #tpu.memory_space<vmem>>, vector<1x1x32xf32>
    %3 = vector.shape_cast %2 : vector<1x1x32xf32> to vector<1x32xf32>
    %4 = vector.broadcast %3 : vector<1x32xf32> to vector<8x32xf32>
    %5 = arith.addf %1, %4 : vector<8x32xf32>
    %c0_5 = arith.constant 0 : index
    %c0_6 = arith.constant 0 : index
    %6 = vector.load %arg8[%c0_5, %c0_6] : memref<1x32xf32, #tpu.memory_space<vmem>>, vector<1x32xf32>
    %c0_7 = arith.constant 0 : index
    %c0_8 = arith.constant 0 : index
    %7 = vector.load %arg9[%c0_7, %c0_8] : memref<1x32xf32, #tpu.memory_space<vmem>>, vector<1x32xf32>
    %cst = arith.constant dense<0.000000e+00> : vector<8xf32>
    %8 = vector.multi_reduction <add>, %5, %cst [1] : vector<8x32xf32> to vector<8xf32>
    %9 = vector.shape_cast %8 : vector<8xf32> to vector<8x1xf32>
    %cst_9 = arith.constant 3.200000e+01 : f32
    %10 = vector.broadcast %cst_9 : f32 to vector<8x1xf32>
    %11 = arith.divf %9, %10 : vector<8x1xf32>
    %12 = arith.mulf %5, %5 : vector<8x32xf32>
    %cst_10 = arith.constant dense<0.000000e+00> : vector<8xf32>
    %13 = vector.multi_reduction <add>, %12, %cst_10 [1] : vector<8x32xf32> to vector<8xf32>
    %14 = vector.shape_cast %13 : vector<8xf32> to vector<8x1xf32>
    %cst_11 = arith.constant 3.200000e+01 : f32
    %15 = vector.broadcast %cst_11 : f32 to vector<8x1xf32>
    %16 = arith.divf %14, %15 : vector<8x1xf32>
    %17 = arith.mulf %11, %11 : vector<8x1xf32>
    %18 = arith.subf %16, %17 : vector<8x1xf32>
    %cst_12 = arith.constant 0.000000e+00 : f32
    %19 = vector.broadcast %cst_12 : f32 to vector<8x1xf32>
    %20 = arith.maximumf %18, %19 : vector<8x1xf32>
    %21 = vector.broadcast %11 : vector<8x1xf32> to vector<8x32xf32>
    %22 = arith.subf %5, %21 : vector<8x32xf32>
    %cst_13 = arith.constant 9.99999974E-6 : f32
    %23 = vector.broadcast %cst_13 : f32 to vector<8x1xf32>
    %24 = arith.addf %20, %23 : vector<8x1xf32>
    %25 = math.rsqrt %24 : vector<8x1xf32>
    %26 = vector.broadcast %25 : vector<8x1xf32> to vector<8x32xf32>
    %27 = arith.mulf %22, %26 : vector<8x32xf32>
    %28 = vector.broadcast %6 : vector<1x32xf32> to vector<8x32xf32>
    %29 = arith.mulf %27, %28 : vector<8x32xf32>
    %30 = vector.broadcast %7 : vector<1x32xf32> to vector<8x32xf32>
    %31 = arith.addf %29, %30 : vector<8x32xf32>
    %32 = arith.truncf %31 : vector<8x32xf32> to vector<8x32xbf16>
    %c0_14 = arith.constant 0 : index
    %c0_15 = arith.constant 0 : index
    %33 = vector.load %arg4[%c0_14, %c0_15] : memref<32x64xbf16, #tpu.memory_space<vmem>>, vector<32x64xbf16>
    %cst_16 = arith.constant dense<0.000000e+00> : vector<8x64xf32>
    %34 = tpu.matmul %32, %33, %cst_16 {dimension_numbers = #tpu.dot_dimension_numbers<[1], [0], [0], [1], [0, 0, 1, 1], [], []>} : vector<8x32xbf16>, vector<32x64xbf16>, vector<8x64xf32> -> vector<8x64xf32>
    %c0_17 = arith.constant 0 : index
    %c0_18 = arith.constant 0 : index
    %35 = vector.load %arg5[%c0_17, %c0_18] : memref<1x64xf32, #tpu.memory_space<vmem>>, vector<1x64xf32>
    %36 = vector.broadcast %35 : vector<1x64xf32> to vector<8x64xf32>
    %37 = arith.addf %34, %36 : vector<8x64xf32>
    %cst_19 = arith.constant 0.000000e+00 : f32
    %38 = vector.broadcast %cst_19 : f32 to vector<8x64xf32>
    %39 = arith.maximumf %37, %38 : vector<8x64xf32>
    %40 = arith.truncf %39 : vector<8x64xf32> to vector<8x64xbf16>
    %c0_20 = arith.constant 0 : index
    %c0_21 = arith.constant 0 : index
    %41 = vector.load %arg6[%c0_20, %c0_21] : memref<64x32xbf16, #tpu.memory_space<vmem>>, vector<64x32xbf16>
    %cst_22 = arith.constant dense<0.000000e+00> : vector<8x32xf32>
    %42 = tpu.matmul %40, %41, %cst_22 {dimension_numbers = #tpu.dot_dimension_numbers<[1], [0], [0], [1], [0, 0, 1, 1], [], []>} : vector<8x64xbf16>, vector<64x32xbf16>, vector<8x32xf32> -> vector<8x32xf32>
    %c0_23 = arith.constant 0 : index
    %c0_24 = arith.constant 0 : index
    %43 = vector.load %arg7[%c0_23, %c0_24] : memref<1x32xf32, #tpu.memory_space<vmem>>, vector<1x32xf32>
    %44 = vector.broadcast %43 : vector<1x32xf32> to vector<8x32xf32>
    %45 = arith.addf %42, %44 : vector<8x32xf32>
    %46 = arith.addf %31, %45 : vector<8x32xf32>
    %c0_25 = arith.constant 0 : index
    %c0_26 = arith.constant 0 : index
    %47 = vector.load %arg10[%c0_25, %c0_26] : memref<1x32xf32, #tpu.memory_space<vmem>>, vector<1x32xf32>
    %c0_27 = arith.constant 0 : index
    %c0_28 = arith.constant 0 : index
    %48 = vector.load %arg11[%c0_27, %c0_28] : memref<1x32xf32, #tpu.memory_space<vmem>>, vector<1x32xf32>
    %cst_29 = arith.constant dense<0.000000e+00> : vector<8xf32>
    %49 = vector.multi_reduction <add>, %46, %cst_29 [1] : vector<8x32xf32> to vector<8xf32>
    %50 = vector.shape_cast %49 : vector<8xf32> to vector<8x1xf32>
    %cst_30 = arith.constant 3.200000e+01 : f32
    %51 = vector.broadcast %cst_30 : f32 to vector<8x1xf32>
    %52 = arith.divf %50, %51 : vector<8x1xf32>
    %53 = arith.mulf %46, %46 : vector<8x32xf32>
    %cst_31 = arith.constant dense<0.000000e+00> : vector<8xf32>
    %54 = vector.multi_reduction <add>, %53, %cst_31 [1] : vector<8x32xf32> to vector<8xf32>
    %55 = vector.shape_cast %54 : vector<8xf32> to vector<8x1xf32>
    %cst_32 = arith.constant 3.200000e+01 : f32
    %56 = vector.broadcast %cst_32 : f32 to vector<8x1xf32>
    %57 = arith.divf %55, %56 : vector<8x1xf32>
    %58 = arith.mulf %52, %52 : vector<8x1xf32>
    %59 = arith.subf %57, %58 : vector<8x1xf32>
    %cst_33 = arith.constant 0.000000e+00 : f32
    %60 = vector.broadcast %cst_33 : f32 to vector<8x1xf32>
    %61 = arith.maximumf %59, %60 : vector<8x1xf32>
    %62 = vector.broadcast %52 : vector<8x1xf32> to vector<8x32xf32>
    %63 = arith.subf %46, %62 : vector<8x32xf32>
    %cst_34 = arith.constant 9.99999974E-6 : f32
    %64 = vector.broadcast %cst_34 : f32 to vector<8x1xf32>
    %65 = arith.addf %61, %64 : vector<8x1xf32>
    %66 = math.rsqrt %65 : vector<8x1xf32>
    %67 = vector.broadcast %66 : vector<8x1xf32> to vector<8x32xf32>
    %68 = arith.mulf %63, %67 : vector<8x32xf32>
    %69 = vector.broadcast %47 : vector<1x32xf32> to vector<8x32xf32>
    %70 = arith.mulf %68, %69 : vector<8x32xf32>
    %71 = vector.broadcast %48 : vector<1x32xf32> to vector<8x32xf32>
    %72 = arith.addf %70, %71 : vector<8x32xf32>
    %c0_35 = arith.constant 0 : index
    %c0_36 = arith.constant 0 : index
    %c0_37 = arith.constant 0 : index
    %73 = vector.load %arg12[%c0_35, %c0_36, %c0_37] : memref<1x8x32xf32, #tpu.memory_space<vmem>>, vector<1x8x32xf32>
    %74 = vector.shape_cast %73 : vector<1x8x32xf32> to vector<8x32xf32>
    %75 = vector.shape_cast %72 : vector<8x32xf32> to vector<1x8x32xf32>
    tpu.vector_store %arg12[%c0_35, %c0_36, %c0_37], %75 {strides = array<i32>} : memref<1x8x32xf32, #tpu.memory_space<vmem>>, vector<1x8x32xf32>,
    return
  }
  func.func @transform_0(%arg0: i32, %arg1: i32) -> (i32, i32, i32) {
    %c0_i32 = arith.constant 0 : i32
    %c0_i32_0 = arith.constant 0 : i32
    return %arg1, %arg0, %c0_i32 : i32, i32, i32
  }
  func.func @transform_1(%arg0: i32, %arg1: i32) -> (i32, i32, i32) {
    %c0_i32 = arith.constant 0 : i32
    %c0_i32_0 = arith.constant 0 : i32
    %c0_i32_1 = arith.constant 0 : i32
    return %arg1, %c0_i32, %c0_i32_0 : i32, i32, i32
  }
  func.func @transform_2(%arg0: i32, %arg1: i32) -> (i32, i32) {
    %c0_i32 = arith.constant 0 : i32
    %c0_i32_0 = arith.constant 0 : i32
    %c0_i32_1 = arith.constant 0 : i32
    return %c0_i32, %c0_i32_0 : i32, i32
  }
  func.func @transform_3(%arg0: i32, %arg1: i32) -> (i32, i32) {
    %c0_i32 = arith.constant 0 : i32
    %c0_i32_0 = arith.constant 0 : i32
    %c0_i32_1 = arith.constant 0 : i32
    return %c0_i32, %c0_i32_0 : i32, i32
  }
  func.func @transform_4(%arg0: i32, %arg1: i32) -> (i32, i32) {
    %c0_i32 = arith.constant 0 : i32
    %c0_i32_0 = arith.constant 0 : i32
    %c0_i32_1 = arith.constant 0 : i32
    return %c0_i32, %c0_i32_0 : i32, i32
  }
  func.func @transform_5(%arg0: i32, %arg1: i32) -> (i32, i32) {
    %c0_i32 = arith.constant 0 : i32
    %c0_i32_0 = arith.constant 0 : i32
    %c0_i32_1 = arith.constant 0 : i32
    return %c0_i32, %c0_i32_0 : i32, i32
  }
  func.func @transform_6(%arg0: i32, %arg1: i32) -> (i32, i32) {
    %c0_i32 = arith.constant 0 : i32
    %c0_i32_0 = arith.constant 0 : i32
    %c0_i32_1 = arith.constant 0 : i32
    return %c0_i32, %c0_i32_0 : i32, i32
  }
  func.func @transform_7(%arg0: i32, %arg1: i32) -> (i32, i32) {
    %c0_i32 = arith.constant 0 : i32
    %c0_i32_0 = arith.constant 0 : i32
    %c0_i32_1 = arith.constant 0 : i32
    return %c0_i32, %c0_i32_0 : i32, i32
  }
  func.func @transform_8(%arg0: i32, %arg1: i32) -> (i32, i32) {
    %c0_i32 = arith.constant 0 : i32
    %c0_i32_0 = arith.constant 0 : i32
    %c0_i32_1 = arith.constant 0 : i32
    return %c0_i32, %c0_i32_0 : i32, i32
  }
  func.func @transform_9(%arg0: i32, %arg1: i32) -> (i32, i32) {
    %c0_i32 = arith.constant 0 : i32
    %c0_i32_0 = arith.constant 0 : i32
    %c0_i32_1 = arith.constant 0 : i32
    return %c0_i32, %c0_i32_0 : i32, i32
  }
  func.func @transform_10(%arg0: i32, %arg1: i32) -> (i32, i32, i32) {
    %c0_i32 = arith.constant 0 : i32
    %c0_i32_0 = arith.constant 0 : i32
    return %arg1, %arg0, %c0_i32 : i32, i32, i32
  }
}

module attributes {stable_mosaic.version = 11 : i64} {
  func.func @encoder_row_kernel(%arg0: i32, %arg1: i32, %arg2: memref<1x8x32xf32, #tpu.memory_space<vmem>>, %arg3: memref<1x1x32xf32, #tpu.memory_space<vmem>>, %arg4: memref<32x64xbf16, #tpu.memory_space<vmem>>, %arg5: memref<1x64xf32, #tpu.memory_space<vmem>>, %arg6: memref<64x32xbf16, #tpu.memory_space<vmem>>, %arg7: memref<1x32xf32, #tpu.memory_space<vmem>>, %arg8: memref<1x32xf32, #tpu.memory_space<vmem>>, %arg9: memref<1x32xf32, #tpu.memory_space<vmem>>, %arg10: memref<1x32xf32, #tpu.memory_space<vmem>>, %arg11: memref<1x32xf32, #tpu.memory_space<vmem>>, %arg12: memref<1x8x32xf32, #tpu.memory_space<vmem>>) attributes {dimension_semantics = [#tpu.dimension_semantics<parallel>, #tpu.dimension_semantics<parallel>], iteration_bounds = array<i64: 1, 2>, scalar_prefetch = 0 : i64, scratch_operands = 0 : i64, tpu.core_type = #tpu.core_type<tc>, window_params = [{transform_indices = @transform_0, window_bounds = array<i64: 1, 8, 32>}, {transform_indices = @transform_1, window_bounds = array<i64: 1, 1, 32>}, {pipeline_mode = #tpu.pipeline_mode<synchronous>, transform_indices = @transform_2, window_bounds = array<i64: 32, 64>}, {pipeline_mode = #tpu.pipeline_mode<synchronous>, transform_indices = @transform_3, window_bounds = array<i64: 1, 64>}, {pipeline_mode = #tpu.pipeline_mode<synchronous>, transform_indices = @transform_4, window_bounds = array<i64: 64, 32>}, {pipeline_mode = #tpu.pipeline_mode<synchronous>, transform_indices = @transform_5, window_bounds = array<i64: 1, 32>}, {pipeline_mode = #tpu.pipeline_mode<synchronous>, transform_indices = @transform_6, window_bounds = array<i64: 1, 32>}, {pipeline_mode = #tpu.pipeline_mode<synchronous>, transform_indices = @transform_7, window_bounds = array<i64: 1, 32>}, {pipeline_mode = #tpu.pipeline_mode<synchronous>, transform_indices = @transform_8, window_bounds = array<i64: 1, 32>}, {pipeline_mode = #tpu.pipeline_mode<synchronous>, transform_indices = @transform_9, window_bounds = array<i64: 1, 32>}, {transform_indices = @transform_10, window_bounds = array<i64: 1, 8, 32>}]} {
    %c0 = arith.constant 0 : index
    %c0_0 = arith.constant 0 : index
    %c0_1 = arith.constant 0 : index
    %0 = vector.load %arg2[%c0, %c0_0, %c0_1] : memref<1x8x32xf32, #tpu.memory_space<vmem>>, vector<1x8x32xf32>
    %1 = vector.shape_cast %0 : vector<1x8x32xf32> to vector<8x32xf32>
    %c0_2 = arith.constant 0 : index
    %c0_3 = arith.constant 0 : index
    %c0_4 = arith.constant 0 : index
    %2 = vector.load %arg3[%c0_2, %c0_3, %c0_4] : memref<1x1x32xf32, #tpu.memory_space<vmem>>, vector<1x1x32xf32>
    %3 = vector.shape_cast %2 : vector<1x1x32xf32> to vector<1x32xf32>
    %4 = vector.broadcast %3 : vector<1x32xf32> to vector<8x32xf32>
    %5 = arith.addf %1, %4 : vector<8x32xf32>
    %c0_5 = arith.constant 0 : index
    %c0_6 = arith.constant 0 : index
    %6 = vector.load %arg8[%c0_5, %c0_6] : memref<1x32xf32, #tpu.memory_space<vmem>>, vector<1x32xf32>
    %c0_7 = arith.constant 0 : index
    %c0_8 = arith.constant 0 : index
    %7 = vector.load %arg9[%c0_7, %c0_8] : memref<1x32xf32, #tpu.memory_space<vmem>>, vector<1x32xf32>
    %cst = arith.constant dense<0.000000e+00> : vector<8xf32>
    %8 = vector.multi_reduction <add>, %5, %cst [1] : vector<8x32xf32> to vector<8xf32>
    %9 = vector.shape_cast %8 : vector<8xf32> to vector<8x1xf32>
    %cst_9 = arith.constant 3.200000e+01 : f32
    %10 = vector.broadcast %cst_9 : f32 to vector<8x1xf32>
    %11 = arith.divf %9, %10 : vector<8x1xf32>
    %12 = arith.mulf %5, %5 : vector<8x32xf32>
    %cst_10 = arith.constant dense<0.000000e+00> : vector<8xf32>
    %13 = vector.multi_reduction <add>, %12, %cst_10 [1] : vector<8x32xf32> to vector<8xf32>
    %14 = vector.shape_cast %13 : vector<8xf32> to vector<8x1xf32>
    %cst_11 = arith.constant 3.200000e+01 : f32
    %15 = vector.broadcast %cst_11 : f32 to vector<8x1xf32>
    %16 = arith.divf %14, %15 : vector<8x1xf32>
    %17 = arith.mulf %11, %11 : vector<8x1xf32>
    %18 = arith.subf %16, %17 : vector<8x1xf32>
    %cst_12 = arith.constant 0.000000e+00 : f32
    %19 = vector.broadcast %cst_12 : f32 to vector<8x1xf32>
    %20 = arith.maximumf %18, %19 : vector<8x1xf32>
    %21 = vector.broadcast %11 : vector<8x1xf32> to vector<8x32xf32>
    %22 = arith.subf %5, %21 : vector<8x32xf32>
    %cst_13 = arith.constant 9.99999974E-6 : f32
    %23 = vector.broadcast %cst_13 : f32 to vector<8x1xf32>
    %24 = arith.addf %20, %23 : vector<8x1xf32>
    %25 = math.rsqrt %24 : vector<8x1xf32>
    %26 = vector.broadcast %25 : vector<8x1xf32> to vector<8x32xf32>
    %27 = arith.mulf %22, %26 : vector<8x32xf32>
    %28 = vector.broadcast %6 : vector<1x32xf32> to vector<8x32xf32>
    %29 = arith.mulf %27, %28 : vector<8x32xf32>
    %30 = vector.broadcast %7 : vector<1x32xf32> to vector<8x32xf32>
    %31 = arith.addf %29, %30 : vector<8x32xf32>
    %32 = arith.truncf %31 : vector<8x32xf32> to vector<8x32xbf16>
    %c0_14 = arith.constant 0 : index
    %c0_15 = arith.constant 0 : index
    %33 = vector.load %arg4[%c0_14, %c0_15] : memref<32x64xbf16, #tpu.memory_space<vmem>>, vector<32x64xbf16>
    %cst_16 = arith.constant dense<0.000000e+00> : vector<8x64xf32>
    %34 = tpu.matmul %32, %33, %cst_16 {dimension_numbers = #tpu.dot_dimension_numbers<[1], [0], [0], [1], [0, 0, 1, 1], [], []>} : vector<8x32xbf16>, vector<32x64xbf16>, vector<8x64xf32> -> vector<8x64xf32>
    %c0_17 = arith.constant 0 : index
    %c0_18 = arith.constant 0 : index
    %35 = vector.load %arg5[%c0_17, %c0_18] : memref<1x64xf32, #tpu.memory_space<vmem>>, vector<1x64xf32>
    %36 = vector.broadcast %35 : vector<1x64xf32> to vector<8x64xf32>
    %37 = arith.addf %34, %36 : vector<8x64xf32>
    %cst_19 = arith.constant 0.000000e+00 : f32
    %38 = vector.broadcast %cst_19 : f32 to vector<8x64xf32>
    %39 = arith.maximumf %37, %38 : vector<8x64xf32>
    %40 = arith.truncf %39 : vector<8x64xf32> to vector<8x64xbf16>
    %c0_20 = arith.constant 0 : index
    %c0_21 = arith.constant 0 : index
    %41 = vector.load %arg6[%c0_20, %c0_21] : memref<64x32xbf16, #tpu.memory_space<vmem>>, vector<64x32xbf16>
    %cst_22 = arith.constant dense<0.000000e+00> : vector<8x32xf32>
    %42 = tpu.matmul %40, %41, %cst_22 {dimension_numbers = #tpu.dot_dimension_numbers<[1], [0], [0], [1], [0, 0, 1, 1], [], []>} : vector<8x64xbf16>, vector<64x32xbf16>, vector<8x32xf32> -> vector<8x32xf32>
    %c0_23 = arith.constant 0 : index
    %c0_24 = arith.constant 0 : index
    %43 = vector.load %arg7[%c0_23, %c0_24] : memref<1x32xf32, #tpu.memory_space<vmem>>, vector<1x32xf32>
    %44 = vector.broadcast %43 : vector<1x32xf32> to vector<8x32xf32>
    %45 = arith.addf %42, %44 : vector<8x32xf32>
    %46 = arith.addf %31, %45 : vector<8x32xf32>
    %c0_25 = arith.constant 0 : index
    %c0_26 = arith.constant 0 : index
    %47 = vector.load %arg10[%c0_25, %c0_26] : memref<1x32xf32, #tpu.memory_space<vmem>>, vector<1x32xf32>
    %c0_27 = arith.constant 0 : index
    %c0_28 = arith.constant 0 : index
    %48 = vector.load %arg11[%c0_27, %c0_28] : memref<1x32xf32, #tpu.memory_space<vmem>>, vector<1x32xf32>
    %cst_29 = arith.constant dense<0.000000e+00> : vector<8xf32>
    %49 = vector.multi_reduction <add>, %46, %cst_29 [1] : vector<8x32xf32> to vector<8xf32>
    %50 = vector.shape_cast %49 : vector<8xf32> to vector<8x1xf32>
    %cst_30 = arith.constant 3.200000e+01 : f32
    %51 = vector.broadcast %cst_30 : f32 to vector<8x1xf32>
    %52 = arith.divf %50, %51 : vector<8x1xf32>
    %53 = arith.mulf %46, %46 : vector<8x32xf32>
    %cst_31 = arith.constant dense<0.000000e+00> : vector<8xf32>
    %54 = vector.multi_reduction <add>, %53, %cst_31 [1] : vector<8x32xf32> to vector<8xf32>
    %55 = vector.shape_cast %54 : vector<8xf32> to vector<8x1xf32>
    %cst_32 = arith.constant 3.200000e+01 : f32
    %56 = vector.broadcast %cst_32 : f32 to vector<8x1xf32>
    %57 = arith.divf %55, %56 : vector<8x1xf32>
    %58 = arith.mulf %52, %52 : vector<8x1xf32>
    %59 = arith.subf %57, %58 : vector<8x1xf32>
    %cst_33 = arith.constant 0.000000e+00 : f32
    %60 = vector.broadcast %cst_33 : f32 to vector<8x1xf32>
    %61 = arith.maximumf %59, %60 : vector<8x1xf32>
    %62 = vector.broadcast %52 : vector<8x1xf32> to vector<8x32xf32>
    %63 = arith.subf %46, %62 : vector<8x32xf32>
    %cst_34 = arith.constant 9.99999974E-6 : f32
    %64 = vector.broadcast %cst_34 : f32 to vector<8x1xf32>
    %65 = arith.addf %61, %64 : vector<8x1xf32>
    %66 = math.rsqrt %65 : vector<8x1xf32>
    %67 = vector.broadcast %66 : vector<8x1xf32> to vector<8x32xf32>
    %68 = arith.mulf %63, %67 : vector<8x32xf32>
    %69 = vector.broadcast %47 : vector<1x32xf32> to vector<8x32xf32>
    %70 = arith.mulf %68, %69 : vector<8x32xf32>
    %71 = vector.broadcast %48 : vector<1x32xf32> to vector<8x32xf32>
    %72 = arith.addf %70, %71 : vector<8x32xf32>
    %c0_35 = arith.constant 0 : index
    %c0_36 = arith.constant 0 : index
    %c0_37 = arith.constant 0 : index
    %73 = vector.load %arg12[%c0_35, %c0_36, %c0_37] : memref<1x8x32xf32, #tpu.memory_space<vmem>>, vector<1x8x32xf32>
    %74 = vector.shape_cast %73 : vector<1x8x32xf32> to vector<8x32xf32>
    %75 = vector.shape_cast %72 : vector<8x32xf32> to vector<1x8x32xf32>
    tpu.vector_store %arg12[%c0_35, %c0_36, %c0_37], %75 {strides = array<i32>} : memref<1x8x32xf32, #tpu.memory_space<vmem>>, vector<1x8x32xf32>,
    return
  }
  func.func @transform_0(%arg0: i32, %arg1: i32) -> (i32, i32, i32) {
    %c0_i32 = arith.constant 0 : i32
    %c0_i32_0 = arith.constant 0 : i32
    return %arg1, %arg0, %c0_i32 : i32, i32, i32
  }
  func.func @transform_1(%arg0: i32, %arg1: i32) -> (i32, i32, i32) {
    %c0_i32 = arith.constant 0 : i32
    %c0_i32_0 = arith.constant 0 : i32
    %c0_i32_1 = arith.constant 0 : i32
    return %arg1, %c0_i32, %c0_i32_0 : i32, i32, i32
  }
  func.func @transform_2(%arg0: i32, %arg1: i32) -> (i32, i32) {
    %c0_i32 = arith.constant 0 : i32
    %c0_i32_0 = arith.constant 0 : i32
    %c0_i32_1 = arith.constant 0 : i32
    return %c0_i32, %c0_i32_0 : i32, i32
  }
  func.func @transform_3(%arg0: i32, %arg1: i32) -> (i32, i32) {
    %c0_i32 = arith.constant 0 : i32
    %c0_i32_0 = arith.constant 0 : i32
    %c0_i32_1 = arith.constant 0 : i32
    return %c0_i32, %c0_i32_0 : i32, i32
  }
  func.func @transform_4(%arg0: i32, %arg1: i32) -> (i32, i32) {
    %c0_i32 = arith.constant 0 : i32
    %c0_i32_0 = arith.constant 0 : i32
    %c0_i32_1 = arith.constant 0 : i32
    return %c0_i32, %c0_i32_0 : i32, i32
  }
  func.func @transform_5(%arg0: i32, %arg1: i32) -> (i32, i32) {
    %c0_i32 = arith.constant 0 : i32
    %c0_i32_0 = arith.constant 0 : i32
    %c0_i32_1 = arith.constant 0 : i32
    return %c0_i32, %c0_i32_0 : i32, i32
  }
  func.func @transform_6(%arg0: i32, %arg1: i32) -> (i32, i32) {
    %c0_i32 = arith.constant 0 : i32
    %c0_i32_0 = arith.constant 0 : i32
    %c0_i32_1 = arith.constant 0 : i32
    return %c0_i32, %c0_i32_0 : i32, i32
  }
  func.func @transform_7(%arg0: i32, %arg1: i32) -> (i32, i32) {
    %c0_i32 = arith.constant 0 : i32
    %c0_i32_0 = arith.constant 0 : i32
    %c0_i32_1 = arith.constant 0 : i32
    return %c0_i32, %c0_i32_0 : i32, i32
  }
  func.func @transform_8(%arg0: i32, %arg1: i32) -> (i32, i32) {
    %c0_i32 = arith.constant 0 : i32
    %c0_i32_0 = arith.constant 0 : i32
    %c0_i32_1 = arith.constant 0 : i32
    return %c0_i32, %c0_i32_0 : i32, i32
  }
  func.func @transform_9(%arg0: i32, %arg1: i32) -> (i32, i32) {
    %c0_i32 = arith.constant 0 : i32
    %c0_i32_0 = arith.constant 0 : i32
    %c0_i32_1 = arith.constant 0 : i32
    return %c0_i32, %c0_i32_0 : i32, i32
  }
  func.func @transform_10(%arg0: i32, %arg1: i32) -> (i32, i32, i32) {
    %c0_i32 = arith.constant 0 : i32
    %c0_i32_0 = arith.constant 0 : i32
    return %arg1, %arg0, %c0_i32 : i32, i32, i32
  }
}

</mosaic_0001>

<bundles_post_ra>
// kernel: tpu_custom_call.1
= control target key start
LH: loop header
LB: loop body
LE: loop exit
PB: predicated region body
PF: predicated region fallthrough
CT: control target
= control target key end

     0   :  { %s1135_s0 = inlined_call_operand.vmem [shape: f32[2,8,32], index: 0, kind: input, shape index: {}]   ;;  %s1136_s1 = inlined_call_operand.vmem [shape: f32[2,1,32], index: 1, kind: input, shape index: {}]   ;;  %s1137_s2 = inlined_call_operand.vmem [shape: bf16[32,64], index: 2, kind: input, shape index: {}]   ;;  %s1138_s3 = inlined_call_operand.vmem [shape: f32[1,64], index: 3, kind: input, shape index: {}]   ;;  %s1139_s4 = inlined_call_operand.vmem [shape: bf16[64,32], index: 4, kind: input, shape index: {}]   ;;  %s1140_s5 = inlined_call_operand.vmem [shape: f32[1,32], index: 5, kind: input, shape index: {}]   ;;  %s1141_s6 = inlined_call_operand.vmem [shape: f32[1,32], index: 6, kind: input, shape index: {}]   ;;  %s1142_s7 = inlined_call_operand.vmem [shape: f32[1,32], index: 7, kind: input, shape index: {}]   ;;  %s1143_s8 = inlined_call_operand.vmem [shape: f32[1,32], index: 8, kind: input, shape index: {}]   ;;  %s1144_s9 = inlined_call_operand.vmem [shape: f32[1,32], index: 9, kind: input, shape index: {}]   ;;  %s1145_s10 = inlined_call_operand.hbm [shape: f32[2,8,32], index: 10, kind: output, shape index: {}]  }
   0x1   :  { %1146 = sst [smem:[#allocation5_spill]] %s1135_s0 }
   0x2   :  { %1147 = sst [smem:[#allocation6_spill]] %s1136_s1 }
   0x3   :  { %15 = vsyncpa [#allocation3], 0 }
   0x4   :  { %17 = vsyncpa [#allocation3 + $0x1], 0  ;;  %s978_s13 = smov 0   ;;  %s980_s14 = smov 0  }
   0x5   :  { %s982_s15 = smov 0   ;;  %s984_s16 = smov 0  }
   0x6   :  { %s986_s17 = smov 0   ;;  %s988_s18 = smov 0  }
   0x7 LB: > { %s719_s19 = sadd.s32 4294967295, %s918_s18   ;;  %s720_s20 = sadd.s32 4294967294, %s918_s18   ;;  %s918_s18 = sphi %s988_s18, %s23_s18   ;;  %s914_s17 = sphi %s986_s17, %s1156_s17   ;;  %s910_s16 = sphi %s984_s16, %s1155_s16   ;;  %s906_s15 = sphi %s982_s15, %s1154_s15   ;;  %s902_s14 = sphi %s980_s14, %s1153_s14   ;;  %s898_s13 = sphi %s978_s13, %s1152_s13  }
   0x8   : > { %s32_s21 = sadd.s32 1, %s914_s17  ;;  %s266_s22 = sadd.s32 1, %s906_s15 }
   0x9   : > { %p33_p0 = scmp.ge.s32.totalorder %s32_s21, 2  ;;  %p276_p1 = scmp.ne.s32.totalorder %s906_s15, %s902_s14 }
   0xa   : > { %p277_p2 = scmp.eq.s32.totalorder %s719_s19, 1  ;;  %p282_p3 = scmp.ne.s32.totalorder %s902_s14, %s898_s13 }
   0xb   : > { %s1158_s21 = smov (%p33_p0, %s32_s21), 0  ;;  %p283_p5 = scmp.eq.s32.totalorder %s720_s20, 1 }
   0xc   : > { %p1018_p4 = por %p277_p2, %p276_p1  ;;  %s261_s24 = ssub.s32 %s914_s17, %s1158_s21 }
   0xd   : > { %p723_p6 = scmp.ge.s32.totalorder %s918_s18, 1  ;;  %p264_p7 = scmp.eq.s32.totalorder %s261_s24, 0 }
   0xe   : > { %p1025_p8 = por %p283_p5, %p282_p3  ;;  %p341_p9 = scmp.lt.s32.totalorder %s918_s18, 3 }
   0xf   : > { %s1031_s26 = scalar_select %p264_p7, %s906_s15, %s266_s22  }
  0x10   : > { %p342_p10 = pnand %p723_p6, %p341_p9 }
  0x11   : > { %p384_p11 = scmp.lt.s32.totalorder (!%p342_p10), %s910_s16, 1  ;;  %s1150_s1 = sld [smem:[#allocation6_spill]] (!%p342_p10)  ;;  %vm406_vm0 = vcmask (!%p342_p10), 261120   ;;  %v830_v6 = vld [vmem:[%s1137_s2] sm:$0xff] (!%p342_p10)   ;;  %v920_v7 = vmov (!%p342_p10), 0.0   ;;  %vm921_vm1 = vmmov (!%p342_p10), 0  }
  0x12   : > { %345 = sbr.rel (%p342_p10) target bundleno = 826 (0x33a), region = 60  ;;  %s1151_s0 = sld [smem:[#allocation5_spill]] (!%p342_p10)  ;;  %753 = vmatprep.subr.bf16.mxu0 (!%p342_p10), %v920_v7  ;;  %757 = vmatprep.mubr.msk.bf16.mxu0 (!%p342_p10), %vm921_vm1, %v920_v7  ;;  %v831_v8 = vld [vmem:[%s1137_s2 + $0x8] sm:$0xff] (!%p342_p10)   ;;  %v832_v9 = vld [vmem:[%s1139_s4] sm:$0xff] (!%p342_p10)   ;;  %v834_v27 = vld [vmem:[%s1139_s4 + $0x10] sm:$0xff] (!%p342_p10)   ;;  %vm546_vm2 = vcmask (!%p342_p10), 523264  }
  0x13   : > { %754 = vmatpush3.bf16.msra.mxu0 (!%p342_p10), %v830_v6  ;;  %761 = vmatprep.subr.bf16.mxu1 (!%p342_p10), %v920_v7  ;;  %v833_v10 = vld [vmem:[%s1139_s4 + $0x8] sm:$0xff] (!%p342_p10)   ;;  %v727_v21 = vld [vmem:[%s1141_s6] ss:$0 sm:$0xff] (!%p342_p10)  ;;  %v835_v28 = vld [vmem:[%s1139_s4 + $0x18] sm:$0xff] (!%p342_p10)   ;;  %s381_s22 = sand.u32 (!%p342_p10), 1, %s902_s14  }
  0x14   : > { %755 = vmatprep.subr.bf16.mxu0 (!%p342_p10), %v920_v7  ;;  %769 = vmatprep.mubr.msk.bf16.mxu1 (!%p342_p10), %vm921_vm1, %v920_v7  ;;  %v728_v23 = vld [vmem:[%s1142_s7] ss:$0 sm:$0xff] (!%p342_p10)  ;;  %s724_s24 = sshll.u32 (!%p342_p10), %s381_s22, 3 }
  0x15   : > { %762 = vmatpush3.bf16.msra.mxu1 (!%p342_p10), %v832_v9  ;;  %v729_v29 = vld [vmem:[%s1138_s3] ss:$0 sm:$0xff] (!%p342_p10)  ;;  %s383_s12 = scalar_lea.vmem (!%p342_p10), [#allocation2], %s724_s24 }
  0x16   : > { %763 = vmatprep.subr.bf16.mxu1 (!%p342_p10), %v920_v7  ;;  %v733_v37 = vld [vmem:[%s1140_s5] ss:$0 sm:$0xff] (!%p342_p10)  ;;  %s639_s19 = sshll.u32 (!%p342_p10), %s383_s12, 4  ;;  %s1089_s19 = int_to_ptr.vmem [resolvable:$true] %s639_s19 }
  0x17   : > { %756 = vmatpush3.bf16.msra.mxu0 (!%p342_p10), %v831_v8  ;;  %v739_v57 = vld [vmem:[%s1143_s8] ss:$0 sm:$0xff] (!%p342_p10) }
  0x18   : > { %v740_v59 = vld [vmem:[%s1144_s9] ss:$0 sm:$0xff] (!%p342_p10) }
  0x19   : > { %s385_s27 = scalar_select %p384_p11, %s910_s16, 1  ;;  %764 = vmatpush3.bf16.msra.mxu1 %v833_v10 }
  0x1a   : > { %765 = vmatprep.subr.bf16.mxu1 %v920_v7 }
  0x1b   : > { %s725_s28 = sshll.u32 %s385_s27, 3  ;;  %s393_s11 = scalar_lea.vmem %s1150_s1, %s385_s27 }
  0x1c   : > { %s390_s20 = scalar_lea.vmem %s1151_s0, %s725_s28  ;;  %v726_v0 = vld [vmem:[%s393_s11] ss:$0 sm:$0xff]  ;;  %s742_s11 = sshll.u32 %s910_s16, 7 }
  0x1d   : > { %v395_v1 = vld [vmem:[%s390_s20] sm:$0xff]  ;;  %766 = vmatpush3.bf16.msra.mxu1 %v834_v27  ;;  %s1087_s1 = scalar_lea.hbm %s1145_s10, %s742_s11  ;;  %s625_s27 = scalar_lea.sflag [#allocation3], %s381_s22 }
  0x1e   : > { %v403_v2 = vadd.f32 %v726_v0, %v395_v1  ;;  %767 = vmatprep.subr.bf16.mxu1 %v920_v7  ;;  %s840_s28 = scalar_lea.vmem %s1089_s19, 128  ;;  %s922_s16 = smov [#allocation2]  }
  0x1f   : > { %p841_p12 = scmp.ne.s32.totalorder %s1089_s19, %s840_s28  ;;  %s844_s24 = sshll.u32 %s922_s16, 4  ;;  %s845_s24 = int_to_ptr.vmem [resolvable:$false] %s844_s24 }
  0x20   : > { %v407_v3 = vsel %vm406_vm0, %v403_v2, 0.0  ;;  %v412_v4 = vmul.f32 %v403_v2, %v403_v2  ;;  %s846_s29 = scalar_lea.vmem %s845_s24, 256  ;;  %p847_p1 = scmp.lt.s32.totalorder %s1089_s19, %s845_s24 }
  0x21   : > { %408 = vadd.xlane.f32.xlu0 %v407_v3  ;;  %768 = vmatpush3.bf16.msra.mxu1 %v835_v28  ;;  %p842_p13 = pnand %p841_p12, %p1018_p4  ;;  %p848_p2 = scmp.lt.s32.totalorder %s846_s29, %s840_s28 }
  0x22   : > { %v413_v5 = vsel %vm406_vm0, %v412_v4, 0.0 }
  0x23   : > { %p843_p0 = pneg %p842_p13  ;;  %p849_p3 = por %p848_p2, %p847_p1 }
  0x25   : > { %414 = vadd.xlane.f32.xlu0 %v413_v5  ;;  %p850_p5 = pnand %p849_p3, %p843_p0 }
  0xae   : > { %v409_v11 = vpop.xlane.xlu0 %408 }
  0xaf   : > { %v411_v12 = vmul.f32 0.03125, %v409_v11 }
  0xb1   : > { %v417_v14 = vmul.f32 %v411_v12, %v411_v12  ;;  %v420_v19 = vsub.f32 %v403_v2, %v411_v12 }
  0xb2   : > { %v415_v13 = vpop.xlane.xlu0 %414 }
  0xb3   : > { %v416_v15 = vmul.f32 0.03125, %v415_v13 }
  0xb5   : > { %v418_v16 = vsub.f32 %v416_v15, %v417_v14 }
  0xb7   : > { %v419_v17 = vmax.f32 %v418_v16, 0.0 }
  0xb9   : > { %v421_v18 = vadd.f32 1e-05, %v419_v17 }
  0xbb   : > { %836 = vrsqrt.f32 %v421_v18 }
  0xc5   : > { %v837_v20 = vpop.eup %836 }
  0xc6   : > { %v423_v22 = vmul.f32 %v837_v20, %v420_v19 }
  0xc8   : > { %v430_v24 = vmul.f32 %v727_v21, %v423_v22 }
  0xca   : > { %v437_v25 = vadd.f32 %v728_v23, %v430_v24 }
  0xcc   : > { %v438_v26 = vpack.c.bf16 %v437_v25, %v437_v25 }
  0xce   : > { %758 = vmatmul.mubr.msk.bf16.vlgmr.msra.gmra.mrb[0].mxu0 %vm406_vm0, %v438_v26 }
 0x1a1   : > { %v499_v30 = vpop.f32.mrb[0].mxu0 }
 0x1a2   : > { %v500_v31 = vadd.f32 %v729_v29, %v499_v30  ;;  %v759_v32 = vpop.f32.mrb[1].mxu0 }
 0x1a3   : > { %v502_v33 = vpop.f32.mrb[2].mxu0 }
 0x1a4   : > { %v505_v34 = vmax.f32 %v500_v31, 0.0  ;;  %v760_v35 = vpop.f32.mrb[3].mxu0 }
 0x1a6   : > { %v506_v36 = vpack.c.bf16 %v505_v34, %v505_v34 }
 0x1a8   : > { %770 = vmatmul.mubr.msk.bf16.vlgmr.msra.gmra.mrb[0].mxu1 %vm546_vm2, %v506_v36 }
 0x27b   : > { %v584_v38 = vpop.f32.mrb[0].mxu1 }
 0x27c   : > { %v585_v39 = vadd.f32 %v733_v37, %v584_v38  ;;  %v771_v40 = vpop.f32.mrb[1].mxu1 }
 0x27d   : > { %v587_v41 = vpop.f32.mrb[2].mxu1 }
 0x27e   : > { %v590_v42 = vadd.f32 %v585_v39, %v437_v25  ;;  %v772_v43 = vpop.f32.mrb[3].mxu1 }
 0x280   : > { %v593_v44 = vsel %vm406_vm0, %v590_v42, 0.0  ;;  %v597_v45 = vmul.f32 %v590_v42, %v590_v42 }
 0x281   : > { %594 = vadd.xlane.f32.xlu1 %v593_v44 }
 0x282   : > { %v598_v46 = vsel %vm406_vm0, %v597_v45, 0.0 }
 0x285   : > { %599 = vadd.xlane.f32.xlu1 %v598_v46 }
 0x30e   : > { %v595_v47 = vpop.xlane.xlu1 %594 }
 0x30f   : > { %v596_v48 = vmul.f32 0.03125, %v595_v47 }
 0x311   : > { %v602_v50 = vmul.f32 %v596_v48, %v596_v48  ;;  %v605_v55 = vsub.f32 %v590_v42, %v596_v48 }
 0x312   : > { %v600_v49 = vpop.xlane.xlu1 %599 }
 0x313   : > { %v601_v51 = vmul.f32 0.03125, %v600_v49 }
 0x315   : > { %v603_v52 = vsub.f32 %v601_v51, %v602_v50 }
 0x317   : > { %v604_v53 = vmax.f32 %v603_v52, 0.0 }
 0x319   : > { %v606_v54 = vadd.f32 1e-05, %v604_v53 }
 0x31b   : > { %838 = vrsqrt.f32 %v606_v54 }
 0x325   : > { %v839_v56 = vpop.eup %838 }
 0x326   : > { %v608_v58 = vmul.f32 %v839_v56, %v605_v55 }
 0x328   : > { %v615_v60 = vmul.f32 %v739_v57, %v608_v58 }
 0x32a   : > { %v622_v61 = vadd.f32 %v740_v59, %v615_v60 }
 0x32c   : > { %623 = vst.msk [vmem:[%s383_s12] sm:$0xff] %vm406_vm0, %v622_v61 }
 0x32d   : > { %853 = shalt.err (!%p850_p5)
}
 0x32e   : > { %s854_s0 = scalar_lea.hbm %s1087_s1, 128  ;;  %s858_s11 = scalar_lea.hbm %s1145_s10, 256 }
 0x32f   : > { %p855_p6 = scmp.ne.s32.totalorder %s1087_s1, %s854_s0  ;;  %p859_p10 = scmp.lt.u32.totalorder %s1087_s1, %s1145_s10 }
 0x330   : > { %p860_p11 = scmp.lt.u32.totalorder %s858_s11, %s854_s0  ;;  %p862_p13 = scmp.lt.u32.totalorder %s854_s0, %s1087_s1 }
 0x331   : > { %p856_p7 = pnand %p855_p6, %p1018_p4 }
 0x332   : > { %p861_p12 = por %p860_p11, %p859_p10 }
 0x333   : > { %p857_p9 = pneg %p856_p7 }
 0x334   : > { %p863_p0 = por %p862_p13, %p861_p12 }
 0x336   : > { %p864_p1 = pnand %p863_p0, %p857_p9 }
 0x338   : > { %867 = shalt.err (!%p864_p1)
}
 0x339   : > { %773 = dma.vmem_to_hbm [thread:$0]  (%p1018_p4), %s1089_s19, 128, %s1087_s1, %s625_s27  }
 0x33a PF: > { %p779_p2 = scmp.ge.s32.totalorder %s918_s18, 2  ;;  %s651_s28 = sand.u32 1, %s898_s13  }
 0x33b   : > { %s652_s16 = scalar_lea.sflag [#allocation3], %s651_s28 }
 0x33c   : > { %p776_p3 = pnand %p779_p2, %p1025_p8 }
 0x33e   : > { %893 = dma.done.wait (!%p776_p3), %s652_s16, 128  }
 0x33f   : > { %895 = vsyncadd (!%p776_p3), %s652_s16, 4294967168  ;;  %s23_s18 = sadd.s32 1, %s918_s18   ;;  %s1152_s13 = smov %s902_s14 }
 0x340   : > { %p20_p5 = scmp.ge.s32.totalorder %s23_s18, 4   ;;  %s1153_s14 = smov %s906_s15 }
 0x341   : > { %s1154_s15 = smov %s1031_s26  ;;  %s1155_s16 = smov %s914_s17 }
 0x342   : > { %s1156_s17 = smov %s1158_s21  ;;  %22 = sbr.rel (!%p20_p5) target bundleno = 7 (0x7), region = 98 }
 0x349   :  { %657 = vsyncpa [#allocation3], 1 }
 0x34a   :  { %659 = vsyncpa [#allocation3 + $0x1], 1 }

// kernel: tpu_custom_call.1
= control target key start
LH: loop header
LB: loop body
LE: loop exit
PB: predicated region body
PF: predicated region fallthrough
CT: control target
= control target key end

     0   :  { %s1135_s0 = inlined_call_operand.vmem [shape: f32[2,8,32], index: 0, kind: input, shape index: {}]   ;;  %s1136_s1 = inlined_call_operand.vmem [shape: f32[2,1,32], index: 1, kind: input, shape index: {}]   ;;  %s1137_s2 = inlined_call_operand.vmem [shape: bf16[32,64], index: 2, kind: input, shape index: {}]   ;;  %s1138_s3 = inlined_call_operand.vmem [shape: f32[1,64], index: 3, kind: input, shape index: {}]   ;;  %s1139_s4 = inlined_call_operand.vmem [shape: bf16[64,32], index: 4, kind: input, shape index: {}]   ;;  %s1140_s5 = inlined_call_operand.vmem [shape: f32[1,32], index: 5, kind: input, shape index: {}]   ;;  %s1141_s6 = inlined_call_operand.vmem [shape: f32[1,32], index: 6, kind: input, shape index: {}]   ;;  %s1142_s7 = inlined_call_operand.vmem [shape: f32[1,32], index: 7, kind: input, shape index: {}]   ;;  %s1143_s8 = inlined_call_operand.vmem [shape: f32[1,32], index: 8, kind: input, shape index: {}]   ;;  %s1144_s9 = inlined_call_operand.vmem [shape: f32[1,32], index: 9, kind: input, shape index: {}]   ;;  %s1145_s10 = inlined_call_operand.hbm [shape: f32[2,8,32], index: 10, kind: output, shape index: {}]  }
   0x1   :  { %1146 = sst [smem:[#allocation5_spill]] %s1135_s0 }
   0x2   :  { %1147 = sst [smem:[#allocation6_spill]] %s1136_s1 }
   0x3   :  { %15 = vsyncpa [#allocation3], 0 }
   0x4   :  { %17 = vsyncpa [#allocation3 + $0x1], 0  ;;  %s978_s13 = smov 0   ;;  %s980_s14 = smov 0  }
   0x5   :  { %s982_s15 = smov 0   ;;  %s984_s16 = smov 0  }
   0x6   :  { %s986_s17 = smov 0   ;;  %s988_s18 = smov 0  }
   0x7 LB: > { %s719_s19 = sadd.s32 4294967295, %s918_s18   ;;  %s720_s20 = sadd.s32 4294967294, %s918_s18   ;;  %s918_s18 = sphi %s988_s18, %s23_s18   ;;  %s914_s17 = sphi %s986_s17, %s1156_s17   ;;  %s910_s16 = sphi %s984_s16, %s1155_s16   ;;  %s906_s15 = sphi %s982_s15, %s1154_s15   ;;  %s902_s14 = sphi %s980_s14, %s1153_s14   ;;  %s898_s13 = sphi %s978_s13, %s1152_s13  }
   0x8   : > { %s32_s21 = sadd.s32 1, %s914_s17  ;;  %s266_s22 = sadd.s32 1, %s906_s15 }
   0x9   : > { %p33_p0 = scmp.ge.s32.totalorder %s32_s21, 2  ;;  %p276_p1 = scmp.ne.s32.totalorder %s906_s15, %s902_s14 }
   0xa   : > { %p277_p2 = scmp.eq.s32.totalorder %s719_s19, 1  ;;  %p282_p3 = scmp.ne.s32.totalorder %s902_s14, %s898_s13 }
   0xb   : > { %s1158_s21 = smov (%p33_p0, %s32_s21), 0  ;;  %p283_p5 = scmp.eq.s32.totalorder %s720_s20, 1 }
   0xc   : > { %p1018_p4 = por %p277_p2, %p276_p1  ;;  %s261_s24 = ssub.s32 %s914_s17, %s1158_s21 }
   0xd   : > { %p723_p6 = scmp.ge.s32.totalorder %s918_s18, 1  ;;  %p264_p7 = scmp.eq.s32.totalorder %s261_s24, 0 }
   0xe   : > { %p1025_p8 = por %p283_p5, %p282_p3  ;;  %p341_p9 = scmp.lt.s32.totalorder %s918_s18, 3 }
   0xf   : > { %s1031_s26 = scalar_select %p264_p7, %s906_s15, %s266_s22  }
  0x10   : > { %p342_p10 = pnand %p723_p6, %p341_p9 }
  0x11   : > { %p384_p11 = scmp.lt.s32.totalorder (!%p342_p10), %s910_s16, 1  ;;  %s1150_s1 = sld [smem:[#allocation6_spill]] (!%p342_p10)  ;;  %vm406_vm0 = vcmask (!%p342_p10), 261120   ;;  %v830_v6 = vld [vmem:[%s1137_s2] sm:$0xff] (!%p342_p10)   ;;  %v920_v7 = vmov (!%p342_p10), 0.0   ;;  %vm921_vm1 = vmmov (!%p342_p10), 0  }
  0x12   : > { %345 = sbr.rel (%p342_p10) target bundleno = 826 (0x33a), region = 60  ;;  %s1151_s0 = sld [smem:[#allocation5_spill]] (!%p342_p10)  ;;  %753 = vmatprep.subr.bf16.mxu0 (!%p342_p10), %v920_v7  ;;  %757 = vmatprep.mubr.msk.bf16.mxu0 (!%p342_p10), %vm921_vm1, %v920_v7  ;;  %v831_v8 = vld [vmem:[%s1137_s2 + $0x8] sm:$0xff] (!%p342_p10)   ;;  %v832_v9 = vld [vmem:[%s1139_s4] sm:$0xff] (!%p342_p10)   ;;  %v834_v27 = vld [vmem:[%s1139_s4 + $0x10] sm:$0xff] (!%p342_p10)   ;;  %vm546_vm2 = vcmask (!%p342_p10), 523264  }
  0x13   : > { %754 = vmatpush3.bf16.msra.mxu0 (!%p342_p10), %v830_v6  ;;  %761 = vmatprep.subr.bf16.mxu1 (!%p342_p10), %v920_v7  ;;  %v833_v10 = vld [vmem:[%s1139_s4 + $0x8] sm:$0xff] (!%p342_p10)   ;;  %v727_v21 = vld [vmem:[%s1141_s6] ss:$0 sm:$0xff] (!%p342_p10)  ;;  %v835_v28 = vld [vmem:[%s1139_s4 + $0x18] sm:$0xff] (!%p342_p10)   ;;  %s381_s22 = sand.u32 (!%p342_p10), 1, %s902_s14  }
  0x14   : > { %755 = vmatprep.subr.bf16.mxu0 (!%p342_p10), %v920_v7  ;;  %769 = vmatprep.mubr.msk.bf16.mxu1 (!%p342_p10), %vm921_vm1, %v920_v7  ;;  %v728_v23 = vld [vmem:[%s1142_s7] ss:$0 sm:$0xff] (!%p342_p10)  ;;  %s724_s24 = sshll.u32 (!%p342_p10), %s381_s22, 3 }
  0x15   : > { %762 = vmatpush3.bf16.msra.mxu1 (!%p342_p10), %v832_v9  ;;  %v729_v29 = vld [vmem:[%s1138_s3] ss:$0 sm:$0xff] (!%p342_p10)  ;;  %s383_s12 = scalar_lea.vmem (!%p342_p10), [#allocation2], %s724_s24 }
  0x16   : > { %763 = vmatprep.subr.bf16.mxu1 (!%p342_p10), %v920_v7  ;;  %v733_v37 = vld [vmem:[%s1140_s5] ss:$0 sm:$0xff] (!%p342_p10)  ;;  %s639_s19 = sshll.u32 (!%p342_p10), %s383_s12, 4  ;;  %s1089_s19 = int_to_ptr.vmem [resolvable:$true] %s639_s19 }
  0x17   : > { %756 = vmatpush3.bf16.msra.mxu0 (!%p342_p10), %v831_v8  ;;  %v739_v57 = vld [vmem:[%s1143_s8] ss:$0 sm:$0xff] (!%p342_p10) }
  0x18   : > { %v740_v59 = vld [vmem:[%s1144_s9] ss:$0 sm:$0xff] (!%p342_p10) }
  0x19   : > { %s385_s27 = scalar_select %p384_p11, %s910_s16, 1  ;;  %764 = vmatpush3.bf16.msra.mxu1 %v833_v10 }
  0x1a   : > { %765 = vmatprep.subr.bf16.mxu1 %v920_v7 }
  0x1b   : > { %s725_s28 = sshll.u32 %s385_s27, 3  ;;  %s393_s11 = scalar_lea.vmem %s1150_s1, %s385_s27 }
  0x1c   : > { %s390_s20 = scalar_lea.vmem %s1151_s0, %s725_s28  ;;  %v726_v0 = vld [vmem:[%s393_s11] ss:$0 sm:$0xff]  ;;  %s742_s11 = sshll.u32 %s910_s16, 7 }
  0x1d   : > { %v395_v1 = vld [vmem:[%s390_s20] sm:$0xff]  ;;  %766 = vmatpush3.bf16.msra.mxu1 %v834_v27  ;;  %s1087_s1 = scalar_lea.hbm %s1145_s10, %s742_s11  ;;  %s625_s27 = scalar_lea.sflag [#allocation3], %s381_s22 }
  0x1e   : > { %v403_v2 = vadd.f32 %v726_v0, %v395_v1  ;;  %767 = vmatprep.subr.bf16.mxu1 %v920_v7  ;;  %s840_s28 = scalar_lea.vmem %s1089_s19, 128  ;;  %s922_s16 = smov [#allocation2]  }
  0x1f   : > { %p841_p12 = scmp.ne.s32.totalorder %s1089_s19, %s840_s28  ;;  %s844_s24 = sshll.u32 %s922_s16, 4  ;;  %s845_s24 = int_to_ptr.vmem [resolvable:$false] %s844_s24 }
  0x20   : > { %v407_v3 = vsel %vm406_vm0, %v403_v2, 0.0  ;;  %v412_v4 = vmul.f32 %v403_v2, %v403_v2  ;;  %s846_s29 = scalar_lea.vmem %s845_s24, 256  ;;  %p847_p1 = scmp.lt.s32.totalorder %s1089_s19, %s845_s24 }
  0x21   : > { %408 = vadd.xlane.f32.xlu0 %v407_v3  ;;  %768 = vmatpush3.bf16.msra.mxu1 %v835_v28  ;;  %p842_p13 = pnand %p841_p12, %p1018_p4  ;;  %p848_p2 = scmp.lt.s32.totalorder %s846_s29, %s840_s28 }
  0x22   : > { %v413_v5 = vsel %vm406_vm0, %v412_v4, 0.0 }
  0x23   : > { %p843_p0 = pneg %p842_p13  ;;  %p849_p3 = por %p848_p2, %p847_p1 }
  0x25   : > { %414 = vadd.xlane.f32.xlu0 %v413_v5  ;;  %p850_p5 = pnand %p849_p3, %p843_p0 }
  0xae   : > { %v409_v11 = vpop.xlane.xlu0 %408 }
  0xaf   : > { %v411_v12 = vmul.f32 0.03125, %v409_v11 }
  0xb1   : > { %v417_v14 = vmul.f32 %v411_v12, %v411_v12  ;;  %v420_v19 = vsub.f32 %v403_v2, %v411_v12 }
  0xb2   : > { %v415_v13 = vpop.xlane.xlu0 %414 }
  0xb3   : > { %v416_v15 = vmul.f32 0.03125, %v415_v13 }
  0xb5   : > { %v418_v16 = vsub.f32 %v416_v15, %v417_v14 }
  0xb7   : > { %v419_v17 = vmax.f32 %v418_v16, 0.0 }
  0xb9   : > { %v421_v18 = vadd.f32 1e-05, %v419_v17 }
  0xbb   : > { %836 = vrsqrt.f32 %v421_v18 }
  0xc5   : > { %v837_v20 = vpop.eup %836 }
  0xc6   : > { %v423_v22 = vmul.f32 %v837_v20, %v420_v19 }
  0xc8   : > { %v430_v24 = vmul.f32 %v727_v21, %v423_v22 }
  0xca   : > { %v437_v25 = vadd.f32 %v728_v23, %v430_v24 }
  0xcc   : > { %v438_v26 = vpack.c.bf16 %v437_v25, %v437_v25 }
  0xce   : > { %758 = vmatmul.mubr.msk.bf16.vlgmr.msra.gmra.mrb[0].mxu0 %vm406_vm0, %v438_v26 }
 0x1a1   : > { %v499_v30 = vpop.f32.mrb[0].mxu0 }
 0x1a2   : > { %v500_v31 = vadd.f32 %v729_v29, %v499_v30  ;;  %v759_v32 = vpop.f32.mrb[1].mxu0 }
 0x1a3   : > { %v502_v33 = vpop.f32.mrb[2].mxu0 }
 0x1a4   : > { %v505_v34 = vmax.f32 %v500_v31, 0.0  ;;  %v760_v35 = vpop.f32.mrb[3].mxu0 }
 0x1a6   : > { %v506_v36 = vpack.c.bf16 %v505_v34, %v505_v34 }
 0x1a8   : > { %770 = vmatmul.mubr.msk.bf16.vlgmr.msra.gmra.mrb[0].mxu1 %vm546_vm2, %v506_v36 }
 0x27b   : > { %v584_v38 = vpop.f32.mrb[0].mxu1 }
 0x27c   : > { %v585_v39 = vadd.f32 %v733_v37, %v584_v38  ;;  %v771_v40 = vpop.f32.mrb[1].mxu1 }
 0x27d   : > { %v587_v41 = vpop.f32.mrb[2].mxu1 }
 0x27e   : > { %v590_v42 = vadd.f32 %v585_v39, %v437_v25  ;;  %v772_v43 = vpop.f32.mrb[3].mxu1 }
 0x280   : > { %v593_v44 = vsel %vm406_vm0, %v590_v42, 0.0  ;;  %v597_v45 = vmul.f32 %v590_v42, %v590_v42 }
 0x281   : > { %594 = vadd.xlane.f32.xlu1 %v593_v44 }
 0x282   : > { %v598_v46 = vsel %vm406_vm0, %v597_v45, 0.0 }
 0x285   : > { %599 = vadd.xlane.f32.xlu1 %v598_v46 }
 0x30e   : > { %v595_v47 = vpop.xlane.xlu1 %594 }
 0x30f   : > { %v596_v48 = vmul.f32 0.03125, %v595_v47 }
 0x311   : > { %v602_v50 = vmul.f32 %v596_v48, %v596_v48  ;;  %v605_v55 = vsub.f32 %v590_v42, %v596_v48 }
 0x312   : > { %v600_v49 = vpop.xlane.xlu1 %599 }
 0x313   : > { %v601_v51 = vmul.f32 0.03125, %v600_v49 }
 0x315   : > { %v603_v52 = vsub.f32 %v601_v51, %v602_v50 }
 0x317   : > { %v604_v53 = vmax.f32 %v603_v52, 0.0 }
 0x319   : > { %v606_v54 = vadd.f32 1e-05, %v604_v53 }
 0x31b   : > { %838 = vrsqrt.f32 %v606_v54 }
 0x325   : > { %v839_v56 = vpop.eup %838 }
 0x326   : > { %v608_v58 = vmul.f32 %v839_v56, %v605_v55 }
 0x328   : > { %v615_v60 = vmul.f32 %v739_v57, %v608_v58 }
 0x32a   : > { %v622_v61 = vadd.f32 %v740_v59, %v615_v60 }
 0x32c   : > { %623 = vst.msk [vmem:[%s383_s12] sm:$0xff] %vm406_vm0, %v622_v61 }
 0x32d   : > { %853 = shalt.err (!%p850_p5)
}
 0x32e   : > { %s854_s0 = scalar_lea.hbm %s1087_s1, 128  ;;  %s858_s11 = scalar_lea.hbm %s1145_s10, 256 }
 0x32f   : > { %p855_p6 = scmp.ne.s32.totalorder %s1087_s1, %s854_s0  ;;  %p859_p10 = scmp.lt.u32.totalorder %s1087_s1, %s1145_s10 }
 0x330   : > { %p860_p11 = scmp.lt.u32.totalorder %s858_s11, %s854_s0  ;;  %p862_p13 = scmp.lt.u32.totalorder %s854_s0, %s1087_s1 }
 0x331   : > { %p856_p7 = pnand %p855_p6, %p1018_p4 }
 0x332   : > { %p861_p12 = por %p860_p11, %p859_p10 }
 0x333   : > { %p857_p9 = pneg %p856_p7 }
 0x334   : > { %p863_p0 = por %p862_p13, %p861_p12 }
 0x336   : > { %p864_p1 = pnand %p863_p0, %p857_p9 }
 0x338   : > { %867 = shalt.err (!%p864_p1)
}
 0x339   : > { %773 = dma.vmem_to_hbm [thread:$0]  (%p1018_p4), %s1089_s19, 128, %s1087_s1, %s625_s27  }
 0x33a PF: > { %p779_p2 = scmp.ge.s32.totalorder %s918_s18, 2  ;;  %s651_s28 = sand.u32 1, %s898_s13  }
 0x33b   : > { %s652_s16 = scalar_lea.sflag [#allocation3], %s651_s28 }
 0x33c   : > { %p776_p3 = pnand %p779_p2, %p1025_p8 }
 0x33e   : > { %893 = dma.done.wait (!%p776_p3), %s652_s16, 128  }
 0x33f   : > { %895 = vsyncadd (!%p776_p3), %s652_s16, 4294967168  ;;  %s23_s18 = sadd.s32 1, %s918_s18   ;;  %s1152_s13 = smov %s902_s14 }
 0x340   : > { %p20_p5 = scmp.ge.s32.totalorder %s23_s18, 4   ;;  %s1153_s14 = smov %s906_s15 }
 0x341   : > { %s1154_s15 = smov %s1031_s26  ;;  %s1155_s16 = smov %s914_s17 }
 0x342   : > { %s1156_s17 = smov %s1158_s21  ;;  %22 = sbr.rel (!%p20_p5) target bundleno = 7 (0x7), region = 98 }
 0x349   :  { %657 = vsyncpa [#allocation3], 1 }
 0x34a   :  { %659 = vsyncpa [#allocation3 + $0x1], 1 }

</bundles_post_ra>
